<compile_context>
chip_gen: v5e
topology: v5e:2x2
jax: 0.10.0
libtpu: 0.0.40
codegen_flags: <defaults>
</compile_context>

<pallas_src>
import jax
import jax.numpy as jnp
from jax.experimental import pallas as pl
from jax.experimental.pallas import tpu as pltpu


def _md_kick_kernel(scale_ref, q_ref, p_ref, out_ref):
    # Elementwise fused MD kick on one (TN, D) tile, all in VMEM.
    # scale = -delta_t * f lives in SMEM (runtime value, no recompiles).
    scale = scale_ref[0]
    out_ref[...] = p_ref[...] + scale * q_ref[...]


def _choose_tile_rows(N, D, *, bytes_per_elem=4,
                      per_block_budget=2 * 1024 * 1024, prefer_min_blocks=2):
    """Largest multiple-of-8 divisor of N whose (rows, D) block fits the budget.

    With 3 arrays (q, p, out) each double-buffered, total VMEM use is
    ~6 * rows * D * bytes_per_elem, so a 2 MiB per-block budget keeps us
    around 12 MiB — comfortably inside every generation's scoped VMEM once
    vmem_limit_bytes is set to 32 MiB.
    """
    max_rows = max(8, (per_block_budget // (D * bytes_per_elem)) // 8 * 8)
    max_rows = min(max_rows, N)
    best = 8
    for t in range(8, max_rows + 1, 8):
        if N % t == 0:
            best = t
    # Prefer >= prefer_min_blocks grid blocks so the parallel row axis can be
    # sharded across the 2 TensorCores of a v7x chip (neutral on v5e/v6e).
    if N // best < prefer_min_blocks:
        for t in range(best, 7, -8):
            if N % t == 0 and N // t >= prefer_min_blocks:
                best = t
                break
    return best


def md_map_iteration(std_input, *, delta_t, f):
    """Pallas implementation of map_iteration(std_input) -> new momentum.

    std_input: [q, p] with q, p of identical shape (N, D), float32.
    Returns p + delta_t * (-f * q).
    """
    q, p = std_input[0], std_input[1]
    assert q.shape == p.shape and q.dtype == p.dtype
    N, D = q.shape
    assert N % 8 == 0, "N must be a multiple of 8 (sublane width)"
    assert D % 128 == 0, "last dim must be a multiple of 128 (lane width)"

    tile_rows = _choose_tile_rows(N, D, bytes_per_elem=q.dtype.itemsize)
    grid = (N // tile_rows,)
    spec = pl.BlockSpec((tile_rows, D), lambda i: (i, 0))

    # Folded scalar: one VPU multiply saved per element, and runtime-valued so
    # changing delta_t / f between MD steps never triggers a recompile.
    scale = jnp.asarray([-float(delta_t) * float(f)], dtype=q.dtype)

    bytes_per_elem = q.dtype.itemsize
    cost = pl.CostEstimate(
        flops=2 * N * D,
        transcendentals=0,
        bytes_accessed=3 * N * D * bytes_per_elem,
    )

    return pl.pallas_call(
        _md_kick_kernel,
        out_shape=jax.ShapeDtypeStruct((N, D), q.dtype),
        grid=grid,
        in_specs=[
            pl.BlockSpec(memory_space=pltpu.MemorySpace.SMEM),  # scale
            spec,                                               # q
            spec,                                               # p
        ],
        out_specs=spec,
        # Alias the momentum input (operand index 2) to the output: matches
        # the in-place `std_input[1] = ...` semantics of the original module.
        input_output_aliases={2: 0},
        cost_estimate=cost,
        compiler_params=pltpu.CompilerParams(
            dimension_semantics=("parallel",),
            vmem_limit_bytes=32 * 1024 * 1024,
        ),
    )(scale, q, p)


class MDCalc:
    """JAX/Pallas analogue of the PyTorch MD_calc module."""

    def __init__(self, delta_t, f):
        self.delta_t = float(delta_t)
        self.f = float(f)

    def forward(self, std_input):
        # Mirrors: std_input[1] = self.map_iteration(std_input)
        # (functional under jit: callers should use the returned pair).
        std_input[1] = md_map_iteration(
            std_input, delta_t=self.delta_t, f=self.f
        )
        return std_input


if __name__ == "__main__":
    key = jax.random.PRNGKey(0)
    kq, kp = jax.random.split(key)

    # Small, tile-friendly shapes: 64 particles x 128 coordinates/features.
    # (Tile selection picks 32 rows -> a 2-block parallel grid.)
    N, D = 64, 128
    q = jax.random.normal(kq, (N, D), dtype=jnp.float32)
    p = jax.random.normal(kp, (N, D), dtype=jnp.float32)

    delta_t = 0.01
    f = 2.0

    # Pure-JAX reference (computed up-front, before the aliased call).
    ref = p + delta_t * (-f * q)

    module = MDCalc(delta_t=delta_t, f=f)
    std_input = [q, p]
    std_input = module.forward(std_input)
    new_p = jax.block_until_ready(std_input[1])

    assert new_p.shape == ref.shape and new_p.dtype == ref.dtype
    assert jnp.allclose(new_p, ref, atol=1e-6, rtol=1e-6)

    print("KERNEL_OK")
</pallas_src>

<mosaic_0001>
module attributes {stable_mosaic.version = 11 : i64} {
  func.func @_md_kick_kernel(%arg0: i32, %arg1: memref<1xf32, #tpu.memory_space<smem>>, %arg2: memref<32x128xf32, #tpu.memory_space<vmem>>, %arg3: memref<32x128xf32, #tpu.memory_space<vmem>>, %arg4: memref<32x128xf32, #tpu.memory_space<vmem>>) attributes {dimension_semantics = [#tpu.dimension_semantics<parallel>], iteration_bounds = array<i64: 2>, scalar_prefetch = 0 : i64, scratch_operands = 0 : i64, tpu.core_type = #tpu.core_type<tc>, window_params = [{transform_indices = @transform_0, window_bounds = array<i64: 1>}, {transform_indices = @transform_1, window_bounds = array<i64: 32, 128>}, {transform_indices = @transform_2, window_bounds = array<i64: 32, 128>}, {transform_indices = @transform_3, window_bounds = array<i64: 32, 128>}]} {
    %c0 = arith.constant 0 : index
    %0 = memref.load %arg1[%c0] : memref<1xf32, #tpu.memory_space<smem>>
    %c0_0 = arith.constant 0 : index
    %c0_1 = arith.constant 0 : index
    %1 = vector.load %arg3[%c0_0, %c0_1] : memref<32x128xf32, #tpu.memory_space<vmem>>, vector<32x128xf32>
    %c0_2 = arith.constant 0 : index
    %c0_3 = arith.constant 0 : index
    %2 = vector.load %arg2[%c0_2, %c0_3] : memref<32x128xf32, #tpu.memory_space<vmem>>, vector<32x128xf32>
    %3 = vector.broadcast %0 : f32 to vector<32x128xf32>
    %4 = arith.mulf %3, %2 : vector<32x128xf32>
    %5 = arith.addf %1, %4 : vector<32x128xf32>
    %c0_4 = arith.constant 0 : index
    %c0_5 = arith.constant 0 : index
    %6 = vector.load %arg4[%c0_4, %c0_5] : memref<32x128xf32, #tpu.memory_space<vmem>>, vector<32x128xf32>
    tpu.vector_store %arg4[%c0_4, %c0_5], %5 {strides = array<i32>} : memref<32x128xf32, #tpu.memory_space<vmem>>, vector<32x128xf32>,
    return
  }
  func.func @transform_0(%arg0: i32) -> i32 {
    %c0_i32 = arith.constant 0 : i32
    %c0_i32_0 = arith.constant 0 : i32
    return %c0_i32 : i32
  }
  func.func @transform_1(%arg0: i32) -> (i32, i32) {
    %c0_i32 = arith.constant 0 : i32
    %c0_i32_0 = arith.constant 0 : i32
    return %arg0, %c0_i32 : i32, i32
  }
  func.func @transform_2(%arg0: i32) -> (i32, i32) {
    %c0_i32 = arith.constant 0 : i32
    %c0_i32_0 = arith.constant 0 : i32
    return %arg0, %c0_i32 : i32, i32
  }
  func.func @transform_3(%arg0: i32) -> (i32, i32) {
    %c0_i32 = arith.constant 0 : i32
    %c0_i32_0 = arith.constant 0 : i32
    return %arg0, %c0_i32 : i32, i32
  }
}

</mosaic_0001>

<bundles_post_ra>
// kernel: tpu_custom_call.1
= control target key start
LH: loop header
LB: loop body
LE: loop exit
PB: predicated region body
PF: predicated region fallthrough
CT: control target
= control target key end

     0   :  { %s663_s0 = inlined_call_operand.<no memory space> [shape: f32[1], index: 0, kind: input, shape index: {}]   ;;  %s664_s1 = inlined_call_operand.vmem [shape: f32[64,128], index: 1, kind: input, shape index: {}]   ;;  %s665_s2 = inlined_call_operand.hbm [shape: f32[64,128], index: 2, kind: input, shape index: {}, may-alias: {2,3}]   ;;  %s666_s3 = inlined_call_operand.hbm [shape: f32[64,128], index: 3, kind: output, shape index: {}, may-alias: {2,3}]  }
   0x1   :  { %8 = sst [smem:[#allocation2]] %s663_s0 }
   0x2   :  { %9 = vsyncpa [#allocation4], 0 }
   0x3   :  { %11 = vsyncpa [#allocation4 + $0x1], 0 }
   0x4   :  { %12 = vsyncpa [#allocation5], 0 }
   0x5   :  { %14 = vsyncpa [#allocation5 + $0x1], 0  ;;  %s532_s14 = smov 0   ;;  %s534_s15 = smov 0  }
   0x6   :  { %s536_s16 = smov 0   ;;  %s538_s17 = smov 0  }
   0x7 LB: > { %s553_s0 = sadd.s32 4294967295, %s503_s17   ;;  %s339_s18 = sadd.s32 4294967294, %s503_s17   ;;  %s503_s17 = sphi %s538_s17, %s676_s17   ;;  %s499_s16 = sphi %s536_s16, %s675_s16   ;;  %s495_s15 = sphi %s534_s15, %s674_s15   ;;  %s491_s14 = sphi %s532_s14, %s673_s14  }
   0x8   : > { %s557_s19 = sadd.s32 1, %s503_s17   ;;  %s74_s20 = sadd.s32 1, %s499_s16 }
   0x9   : > { %s71_s21 = ssub.s32 %s503_s17, %s557_s19  ;;  %p81_p0 = scmp.ne.s32.totalorder %s499_s16, %s495_s15 }
   0xa   : > { %p72_p1 = scmp.eq.s32.totalorder %s71_s21, 0  ;;  %p82_p2 = scmp.eq.s32.totalorder %s503_s17, 0 }
   0xb   : > { %p87_p3 = scmp.ne.s32.totalorder %s495_s15, %s491_s14  ;;  %p88_p4 = scmp.eq.s32.totalorder %s553_s0, 0 }
   0xc   : > { %s569_s22 = scalar_select %p72_p1, %s499_s16, %s74_s20  }
   0xd   : > { %p571_p5 = por %p82_p2, %p81_p0  ;;  %p575_p6 = por %p88_p4, %p87_p3 }
   0xe   : > { %p111_p7 = scmp.eq.s32.totalorder %s553_s0, 1  ;;  %p117_p8 = scmp.eq.s32.totalorder %s339_s18, 1 }
   0xf   : > { %p369_p10 = scmp.lt.s32.totalorder %s503_s17, 2  ;;  %s149_s27 = sand.u32 1, %s499_s16  }
  0x10   : > { %p582_p11 = por %p111_p7, %p81_p0  ;;  %p586_p12 = por %p117_p8, %p87_p3 }
  0x11   : > { %s355_s28 = sshll.u32 %s503_s17, 5  ;;  %s342_s29 = sshll.u32 %s149_s27, 5 }
  0x12   : > { %s158_s5 = scalar_lea.hbm %s665_s2, %s355_s28  ;;  %s153_s7 = scalar_lea.vmem [#allocation3], %s342_s29 }
  0x13   : > { %s159_s6 = sshll.u32 %s158_s5, 4  ;;  %s161_s8 = sshll.u32 %s153_s7, 4  ;;  %s160_s6 = int_to_ptr.hbm [resolvable:$true] %s159_s6  ;;  %s162_s8 = int_to_ptr.vmem [resolvable:$true] %s161_s8 }
  0x14   : > { %p597_p13 = pnand %p369_p10, %p571_p5  ;;  %p345_p0 = scmp.ge.s32.totalorder %s503_s17, 1 }
  0x15   : > { %p169_p1 = scmp.lt.s32.totalorder %s503_s17, 3  ;;  %s150_s10 = scalar_lea.sflag [#allocation4], %s149_s27 }
  0x16   : > { %s407_s11 = sshra.s32 %s160_s6, 4  ;;  %p411_p3 = pneg %p597_p13  ;;  %s408_s11 = int_to_ptr.hbm [resolvable:$true] %s407_s11 }
  0x17   : > { %s409_s12 = scalar_lea.hbm %s408_s11, 32  ;;  %s414_s20 = scalar_lea.hbm %s665_s2, 64 }
  0x18   : > { %p410_p2 = scmp.ne.s32.totalorder %s408_s11, %s409_s12  ;;  %p415_p5 = scmp.lt.s32.totalorder %s408_s11, %s665_s2 }
  0x19   : > { %p416_p8 = scmp.lt.s32.totalorder %s414_s20, %s409_s12 }
  0x1a   : > { %p412_p4 = pnand %p411_p3, %p410_p2 }
  0x1b   : > { %p417_p10 = por %p416_p8, %p415_p5 }
  0x1c   : > { %p413_p7 = pneg %p412_p4 }
  0x1e   : > { %p418_p9 = pnand %p417_p10, %p413_p7 }
  0x20   : > { %421 = shalt.err (!%p418_p9)
}
  0x21   : > { %s505_s27 = smov 128   ;;  %s506_s28 = smov 8  }
  0x22   : > { %364 = dma.hbm_to_vmem [thread:$0]  (!%p597_p13), %s160_s6, 512, %s162_s8, %s150_s10, %s505_s27, %s505_s27, %s506_s28  }
  0x23   : > { %p170_p2 = pnand %p345_p0, %p169_p1 }
  0x24   : > { %s618_s29 = sand.u32 (!%p170_p2), 1, %s495_s15  }
  0x25   : > { %173 = sbr.rel (%p170_p2) target bundleno = 62 (0x3e), region = 32  ;;  %s346_s30 = sshll.u32 (!%p170_p2), %s618_s29, 5 }
  0x26   : > { %s176_s4 = scalar_lea.sflag (!%p170_p2), [#allocation4], %s618_s29  ;;  %s179_s5 = scalar_lea.vmem (!%p170_p2), [#allocation3], %s346_s30 }
  0x2a   : > { %482 = dma.done.wait (%p575_p6), %s176_s4, 512  }
  0x2b   : > { %484 = vsyncadd (%p575_p6), %s176_s4, 4294966784  ;;  %s348_s6 = sshll.u32 %s553_s0, 2  ;;  %s216_s7 = sld [smem:[#allocation2]]  ;;  %v217_v0 = vld [vmem:[%s179_s5] sm:$0xff]  ;;  %v218_v3 = vld [vmem:[%s179_s5 + $0x8] sm:$0xff] }
  0x2c   : > { %p209_p9 = scmp.lt.s32.totalorder %s348_s6, 7  ;;  %s356_s8 = sshll.u32 %s553_s0, 5  ;;  %v219_v6 = vld [vmem:[%s179_s5 + $0x10] sm:$0xff]  ;;  %v220_v10 = vld [vmem:[%s179_s5 + $0x18] sm:$0xff] }
  0x2d   : > { %s250_s20 = scalar_lea.hbm %s666_s3, %s356_s8  ;;  %s207_s24 = scalar_lea.vmem [#allocation6], %s346_s30 }
  0x2e   : > { %s678_s6 = smov (!%p209_p9, %s348_s6), 7  ;;  %s251_s21 = sshll.u32 %s207_s24, 4  ;;  %s252_s21 = int_to_ptr.vmem [resolvable:$true] %s251_s21 }
  0x2f   : > { %s349_s9 = sshll.u32 %s678_s6, 3  ;;  %s253_s0 = sshll.u32 %s250_s20, 4  ;;  %s254_s0 = int_to_ptr.hbm [resolvable:$true] %s253_s0 }
  0x30   : > { %s212_s12 = scalar_lea.vmem %s664_s1, %s349_s9  ;;  %s239_s23 = scalar_lea.sflag [#allocation5], %s618_s29 }
  0x31   : > { %v221_v1 = vld [vmem:[%s212_s12] sm:$0xff]  ;;  %v225_v2 = vstv %s216_s7  ;;  %v222_v5 = vld [vmem:[%s212_s12 + $0x8] sm:$0xff]  ;;  %v223_v7 = vld [vmem:[%s212_s12 + $0x10] sm:$0xff]  ;;  %s451_s27 = sshra.s32 %s254_s0, 4  ;;  %s457_s5 = scalar_lea.hbm %s666_s3, 64  ;;  %s452_s27 = int_to_ptr.hbm [resolvable:$true] %s451_s27 }
  0x32   : > { %v226_v4 = vmul.f32 %v225_v2, %v221_v1  ;;  %v227_v8 = vmul.f32 %v225_v2, %v222_v5  ;;  %v228_v9 = vmul.f32 %v225_v2, %v223_v7  ;;  %v224_v11 = vld [vmem:[%s212_s12 + $0x18] sm:$0xff]  ;;  %s453_s28 = scalar_lea.hbm %s452_s27, 32  ;;  %p458_p1 = scmp.lt.s32.totalorder %s452_s27, %s666_s3 }
  0x33   : > { %v229_v13 = vmul.f32 %v225_v2, %v224_v11  ;;  %p454_p6 = scmp.ne.s32.totalorder %s452_s27, %s453_s28  ;;  %p459_p3 = scmp.lt.s32.totalorder %s457_s5, %s453_s28 }
  0x34   : > { %v230_v12 = vadd.f32 %v226_v4, %v217_v0  ;;  %v231_v14 = vadd.f32 %v227_v8, %v218_v3  ;;  %v232_v15 = vadd.f32 %v228_v9, %v219_v6 }
  0x35   : > { %v233_v16 = vadd.f32 %v229_v13, %v220_v10  ;;  %p455_p13 = pnand %p454_p6, %p582_p11  ;;  %p460_p4 = por %p459_p3, %p458_p1 }
  0x36   : > { %234 = vst [vmem:[%s207_s24] sm:$0xff] %v230_v12 }
  0x37   : > { %235 = vst [vmem:[%s207_s24 + $0x8] sm:$0xff] %v231_v14  ;;  %p456_p0 = pneg %p455_p13 }
  0x38   : > { %236 = vst [vmem:[%s207_s24 + $0x10] sm:$0xff] %v232_v15 }
  0x39   : > { %237 = vst [vmem:[%s207_s24 + $0x18] sm:$0xff] %v233_v16  ;;  %p461_p7 = pnand %p460_p4, %p456_p0 }
  0x3b   : > { %464 = shalt.err (!%p461_p7)
}
  0x3c   : > { %s507_s29 = smov 128   ;;  %s508_s8 = smov 8  }
  0x3d   : > { %359 = dma.vmem_to_hbm [thread:$0]  (%p582_p11), %s252_s21, 512, %s254_s0, %s239_s23, %s507_s29, %s507_s29, %s508_s8  }
  0x3e PF: > { %s268_s9 = sand.u32 1, %s491_s14   ;;  %p672_p5 = scmp.ge.s32.totalorder %s503_s17, 2 }
  0x3f   : > { %s269_s10 = scalar_lea.sflag [#allocation5], %s268_s9 }
  0x40   : > { %p366_p8 = pnand %p672_p5, %p586_p12 }
  0x42   : > { %p367_p10 = pneg %p366_p8 }
  0x44   : > { %486 = dma.done.wait (%p367_p10), %s269_s10, 512  }
  0x45   : > { %488 = vsyncadd (%p367_p10), %s269_s10, 4294966784  ;;  %p17_p2 = scmp.ge.s32.totalorder %s557_s19, 4   ;;  %s673_s14 = smov %s495_s15 }
  0x46   : > { %s674_s15 = smov %s499_s16  ;;  %s675_s16 = smov %s569_s22 }
  0x47   : > { %s676_s17 = smov %s557_s19  ;;  %19 = sbr.rel (!%p17_p2) target bundleno = 7 (0x7), region = 80 }
  0x4c   :  { %275 = vsyncpa [#allocation4], 1 }
  0x4d   :  { %277 = vsyncpa [#allocation4 + $0x1], 1 }
  0x4e   :  { %278 = vsyncpa [#allocation5], 1 }
  0x4f   :  { %280 = vsyncpa [#allocation5 + $0x1], 1 }

</bundles_post_ra>
